<compile_context>
chip_gen: v7x
topology: tpu7x:2x2x1
jax: 0.10.0
libtpu: 0.0.40
codegen_flags: <defaults>
</compile_context>

<pallas_src>
import math

import jax
import jax.numpy as jnp
from jax.experimental import pallas as pl
from jax.experimental.pallas import tpu as pltpu


def _multiply_kernel(*refs):
    """refs = (x0_ref, ..., x{n-1}_ref, out_ref): elementwise product in f32."""
    in_refs = refs[:-1]
    out_ref = refs[-1]
    acc = in_refs[0][...].astype(jnp.float32)  # ones * x0 == x0 (as f32)
    for r in in_refs[1:]:
        acc = acc * r[...].astype(jnp.float32)
    out_ref[...] = acc


def _ceil_to(x, m):
    return ((x + m - 1) // m) * m


def _multiply_impl(*inputs):
    assert len(inputs) >= 1
    n = len(inputs)
    shape = inputs[0].shape
    for x in inputs:
        assert x.shape == shape, "all inputs must share the same shape"
    total = int(math.prod(shape)) if len(shape) > 0 else 1

    # Zero-element inputs: nothing to compute (and grid=(0,) must be avoided).
    if total == 0:
        return jnp.zeros(shape, jnp.float32)

    # ---- lane-dense 2D view ------------------------------------------------
    # Pick lanes so that (ideally) no padding is needed; pad at most to a
    # multiple of 128 (tiny, and only when total % 128 != 0).
    lanes = 512 if total % 512 == 0 else 128
    padded_total = _ceil_to(total, lanes)  # == total whenever total % lanes == 0
    rows = padded_total // lanes

    # ---- VMEM-budgeted tile-row selection ----------------------------------
    # Double-buffered footprint per tile row:
    #   2 buffers * (sum of input itemsizes + 4 B f32 output) * lanes
    in_bytes_per_elem = sum(x.dtype.itemsize for x in inputs)
    bytes_per_tile_row = 2 * (in_bytes_per_elem + 4) * lanes
    vmem_budget = 24 * 1024 * 1024  # double-buffer budget; limit below is 32 MiB
    cap_rows = max(8, (vmem_budget // bytes_per_tile_row) // 8 * 8)
    cap_rows = min(cap_rows, 1024)

    # Medium/large inputs: force several grid steps so the pipeline overlaps
    # DMA-in / multiply / DMA-out. Small inputs: one block.
    if total >= 64 * 1024:
        desired_rows = _ceil_to(pl.cdiv(rows, 4), 8)
    else:
        desired_rows = _ceil_to(rows, 8)
    tile_rows = max(8, min(desired_rows, cap_rows))
    if rows < 8:
        # Block equals the full array extent in the row dim (allowed by Mosaic).
        tile_rows = rows

    grid_rows = pl.cdiv(rows, tile_rows)  # ragged final block handled by Pallas

    # ---- flatten to the lane-dense view (no pad for 128-divisible sizes) ----
    flats = []
    for x in inputs:
        f = x.reshape(-1)
        if padded_total != total:
            f = jnp.pad(f, (0, padded_total - total))
        flats.append(f.reshape(rows, lanes))

    cost = pl.CostEstimate(
        flops=max(n - 1, 0) * total,
        transcendentals=0,
        bytes_accessed=sum(int(x.size) * x.dtype.itemsize for x in inputs)
        + total * 4,
    )

    out_flat = pl.pallas_call(
        _multiply_kernel,
        out_shape=jax.ShapeDtypeStruct((rows, lanes), jnp.float32),
        grid_spec=pltpu.PrefetchScalarGridSpec(
            num_scalar_prefetch=0,
            grid=(grid_rows,),
            in_specs=[pl.BlockSpec((tile_rows, lanes), lambda i: (i, 0))
                      for _ in flats],
            out_specs=pl.BlockSpec((tile_rows, lanes), lambda i: (i, 0)),
        ),
        compiler_params=pltpu.CompilerParams(
            dimension_semantics=("parallel",),
            vmem_limit_bytes=32 * 1024 * 1024,
        ),
        cost_estimate=cost,
    )(*flats)

    # Identity (free) when no padding was added; otherwise strips the <128-elem pad.
    return out_flat.reshape(-1)[:total].reshape(shape)


multiply = jax.jit(_multiply_impl)


if __name__ == "__main__":
    key = jax.random.PRNGKey(0)
    k0, k1, k2 = jax.random.split(key, 3)

    # Small NCHW inputs, same shape, as the module's forward implies.
    shape = (2, 4, 16, 16)
    inp_list = [
        jax.random.normal(k0, shape, dtype=jnp.float32),
        jax.random.normal(k1, shape, dtype=jnp.float32),
        jax.random.normal(k2, shape, dtype=jnp.float32),
    ]

    out = multiply(*inp_list)
    out = jax.block_until_ready(out)

    # Reference check in plain JAX (result = ones * x0 * x1 * x2).
    ref = jnp.ones(shape, dtype=jnp.float32)
    for x in inp_list:
        ref = ref * x
    assert out.shape == shape and out.dtype == jnp.float32
    assert jnp.allclose(out, ref, atol=1e-6, rtol=1e-6)

    # Extra sanity: a non-512-divisible and a larger multi-tile size.
    for extra_shape in [(3, 5, 7), (4, 8, 64, 64)]:
        ks = jax.random.split(jax.random.PRNGKey(1), 3)
        xs = [jax.random.normal(k, extra_shape, dtype=jnp.float32) for k in ks]
        o = jax.block_until_ready(multiply(*xs))
        r = jnp.ones(extra_shape, jnp.float32)
        for x in xs:
            r = r * x
        assert jnp.allclose(o, r, atol=1e-6, rtol=1e-6)

    print("KERNEL_OK")
</pallas_src>

<mosaic_0001>
module attributes {stable_mosaic.version = 11 : i64} {
  func.func @_multiply_kernel(%arg0: i32, %arg1: memref<4x512xf32, #tpu.memory_space<vmem>>, %arg2: memref<4x512xf32, #tpu.memory_space<vmem>>, %arg3: memref<4x512xf32, #tpu.memory_space<vmem>>, %arg4: memref<4x512xf32, #tpu.memory_space<vmem>>) attributes {dimension_semantics = [#tpu.dimension_semantics<parallel>], iteration_bounds = array<i64: 1>, scalar_prefetch = 0 : i64, scratch_operands = 0 : i64, tpu.core_type = #tpu.core_type<tc>, window_params = [{transform_indices = @transform_0, window_bounds = array<i64: 4, 512>}, {transform_indices = @transform_1, window_bounds = array<i64: 4, 512>}, {transform_indices = @transform_2, window_bounds = array<i64: 4, 512>}, {transform_indices = @transform_3, window_bounds = array<i64: 4, 512>}]} {
    %c0 = arith.constant 0 : index
    %c0_0 = arith.constant 0 : index
    %0 = vector.load %arg1[%c0, %c0_0] : memref<4x512xf32, #tpu.memory_space<vmem>>, vector<4x512xf32>
    %c0_1 = arith.constant 0 : index
    %c0_2 = arith.constant 0 : index
    %1 = vector.load %arg2[%c0_1, %c0_2] : memref<4x512xf32, #tpu.memory_space<vmem>>, vector<4x512xf32>
    %2 = arith.mulf %0, %1 : vector<4x512xf32>
    %c0_3 = arith.constant 0 : index
    %c0_4 = arith.constant 0 : index
    %3 = vector.load %arg3[%c0_3, %c0_4] : memref<4x512xf32, #tpu.memory_space<vmem>>, vector<4x512xf32>
    %4 = arith.mulf %2, %3 : vector<4x512xf32>
    %c0_5 = arith.constant 0 : index
    %c0_6 = arith.constant 0 : index
    %5 = vector.load %arg4[%c0_5, %c0_6] : memref<4x512xf32, #tpu.memory_space<vmem>>, vector<4x512xf32>
    tpu.vector_store %arg4[%c0_5, %c0_6], %4 {strides = array<i32>} : memref<4x512xf32, #tpu.memory_space<vmem>>, vector<4x512xf32>,
    return
  }
  func.func @transform_0(%arg0: i32) -> (i32, i32) {
    %c0_i32 = arith.constant 0 : i32
    %c0_i32_0 = arith.constant 0 : i32
    return %arg0, %c0_i32 : i32, i32
  }
  func.func @transform_1(%arg0: i32) -> (i32, i32) {
    %c0_i32 = arith.constant 0 : i32
    %c0_i32_0 = arith.constant 0 : i32
    return %arg0, %c0_i32 : i32, i32
  }
  func.func @transform_2(%arg0: i32) -> (i32, i32) {
    %c0_i32 = arith.constant 0 : i32
    %c0_i32_0 = arith.constant 0 : i32
    return %arg0, %c0_i32 : i32, i32
  }
  func.func @transform_3(%arg0: i32) -> (i32, i32) {
    %c0_i32 = arith.constant 0 : i32
    %c0_i32_0 = arith.constant 0 : i32
    return %arg0, %c0_i32 : i32, i32
  }
}

</mosaic_0001>

<bundles_post_ra>
// kernel: _multiply_impl.1
= control target key start
LH: loop header
LB: loop body
LE: loop exit
PB: predicated region body
PF: predicated region fallthrough
CT: control target
= control target key end

     0   :  { %s74_s0 = inlined_call_operand.vmem [shape: f32[4,512], index: 0, kind: input, shape index: {}]   ;;  %s75_s1 = inlined_call_operand.vmem [shape: f32[4,512], index: 1, kind: input, shape index: {}]   ;;  %s76_s2 = inlined_call_operand.vmem [shape: f32[4,512], index: 2, kind: input, shape index: {}]   ;;  %s77_s3 = inlined_call_operand.vmem [shape: f32[4,512], index: 3, kind: output, shape index: {}]  }
   0x1   :  { %v14_v0 = vld [vmem:[%s74_s0] sm:$0xff]  ;;  %v15_v4 = vld [vmem:[%s74_s0 + $0x8] sm:$0xff] }
   0x2   :  { %v16_v1 = vld [vmem:[%s75_s1] sm:$0xff]  ;;  %v17_v5 = vld [vmem:[%s75_s1 + $0x8] sm:$0xff] }
   0x3   :  { %v20_v2 = vld [vmem:[%s76_s2] sm:$0xff]  ;;  %v18_v3 = vmul.f32 %v16_v1, %v14_v0  ;;  %v21_v6 = vld [vmem:[%s76_s2 + $0x8] sm:$0xff]  ;;  %v19_v7 = vmul.f32 %v17_v5, %v15_v4 }
   0x5   :  { %v22_v8 = vmul.f32 %v20_v2, %v18_v3  ;;  %v23_v9 = vmul.f32 %v21_v6, %v19_v7 }
   0x7   :  { %24 = vst [vmem:[%s77_s3] sm:$0xff] %v22_v8  ;;  %25 = vst [vmem:[%s77_s3 + $0x8] sm:$0xff] %v23_v9 }

</bundles_post_ra>
